<compile_context>
chip_gen: v7x
topology: tpu7x:2x2x1
jax: 0.10.0
libtpu: 0.0.40
codegen_flags: <defaults>
</compile_context>

<pallas_src>
import math

import jax
import jax.numpy as jnp
from jax.experimental import pallas as pl
from jax.experimental.pallas import tpu as pltpu

_GELU_C = math.sqrt(2.0 / math.pi)


def _gelu_tanh(x):
    # GELU(approximate='tanh'): 0.5 * x * (1 + tanh(sqrt(2/pi) * (x + 0.044715 x^3)))
    return 0.5 * x * (1.0 + jnp.tanh(_GELU_C * (x + 0.044715 * x * x * x)))


def mlp_kernel(x_ref, wfc_ref, bfc_ref, wproj_ref, bproj_ref, o_ref, acc_ref):
    # x_ref:     (tm, C)   bf16 token tile (reused across the H axis)
    # wfc_ref:   (C, th)   bf16 column block of W_fc
    # bfc_ref:   (1, th)   f32 bias chunk
    # wproj_ref: (th, C)   bf16 row block of W_proj
    # bproj_ref: (1, C)    f32 bias
    # o_ref:     (tm, C)   output tile (written on last H step)
    # acc_ref:   (tm, C)   f32 VMEM accumulator
    h_idx = pl.program_id(1)

    @pl.when(h_idx == 0)
    def _():
        acc_ref[...] = jnp.zeros_like(acc_ref)

    # c_fc chunk: (tm, C) @ (C, th) -> (tm, th), bf16 in / f32 accumulate on MXU.
    h = jnp.dot(x_ref[...], wfc_ref[...], preferred_element_type=jnp.float32)
    h = h + bfc_ref[...]          # f32 bias
    h = _gelu_tanh(h)             # f32 GELU (tanh -> EUP, free under MXU work)

    # c_proj partial: (tm, th) @ (th, C) accumulated into f32 scratch.
    acc_ref[...] += jnp.dot(
        h.astype(wproj_ref.dtype), wproj_ref[...],
        preferred_element_type=jnp.float32)

    @pl.when(h_idx == pl.num_programs(1) - 1)
    def _():
        o_ref[...] = (acc_ref[...] + bproj_ref[...]).astype(o_ref.dtype)


def _round_up(x, m):
    return (x + m - 1) // m * m


def _pick_hidden_tile(H, target):
    """Largest 128-multiple divisor of H that is <= target (else full H)."""
    if H <= target:
        return H
    th = (target // 128) * 128
    while th >= 128:
        if H % th == 0:
            return th
        th -= 128
    return H


def mlp_forward(x, w_fc, b_fc, w_proj, b_proj, *, tm=256, th=512):
    """x: (B, T, C) float32. w_fc: (C, 4C), w_proj: (4C, C). Returns (B, T, C)."""
    B, T, C = x.shape
    H = w_fc.shape[1]  # 4*C
    M = B * T

    # Row tile: MXU-matched, but don't over-pad tiny inputs; pad M up to a
    # tile multiple instead of asserting divisibility.
    tm = min(tm, _round_up(M, 8))
    M_pad = _round_up(M, tm)
    th = _pick_hidden_tile(H, th)

    x2d = x.reshape(M, C)
    if M_pad != M:
        x2d = jnp.pad(x2d, ((0, M_pad - M), (0, 0)))

    # bf16 MXU inputs; biases / accumulation / GELU stay f32.
    x_bf16 = x2d.astype(jnp.bfloat16)
    wfc_bf16 = w_fc.astype(jnp.bfloat16)
    wproj_bf16 = w_proj.astype(jnp.bfloat16)
    bfc2d = b_fc.reshape(1, H).astype(jnp.float32)
    bproj2d = b_proj.reshape(1, C).astype(jnp.float32)

    grid = (M_pad // tm, H // th)

    # Advisory cost estimate for XLA's scheduler.
    cost = pl.CostEstimate(
        flops=2 * 2 * M_pad * C * H,            # two matmuls
        transcendentals=M_pad * H,              # tanh per hidden element
        bytes_accessed=(x_bf16.size * x_bf16.dtype.itemsize
                        + grid[0] * wfc_bf16.size * wfc_bf16.dtype.itemsize
                        + grid[0] * wproj_bf16.size * wproj_bf16.dtype.itemsize
                        + bfc2d.size * 4 + bproj2d.size * 4
                        + M_pad * C * x.dtype.itemsize),
    )

    out2d = pl.pallas_call(
        mlp_kernel,
        out_shape=jax.ShapeDtypeStruct((M_pad, C), x.dtype),
        grid_spec=pltpu.PrefetchScalarGridSpec(
            num_scalar_prefetch=0,
            grid=grid,
            in_specs=[
                pl.BlockSpec((tm, C), lambda i, h: (i, 0)),   # x tile
                pl.BlockSpec((C, th), lambda i, h: (0, h)),   # W_fc column block
                pl.BlockSpec((1, th), lambda i, h: (0, h)),   # b_fc chunk
                pl.BlockSpec((th, C), lambda i, h: (h, 0)),   # W_proj row block
                pl.BlockSpec((1, C), lambda i, h: (0, 0)),    # b_proj
            ],
            out_specs=pl.BlockSpec((tm, C), lambda i, h: (i, 0)),
            scratch_shapes=[pltpu.VMEM((tm, C), jnp.float32)],
        ),
        compiler_params=pltpu.CompilerParams(
            # M axis parallel (megacore shards token tiles), H axis is a reduction.
            dimension_semantics=("parallel", "arbitrary"),
            vmem_limit_bytes=48 * 1024 * 1024,
        ),
        cost_estimate=cost,
    )(x_bf16, wfc_bf16, bfc2d, wproj_bf16, bproj2d)

    if M_pad != M:
        out2d = out2d[:M]
    return out2d.reshape(B, T, C)


def init_mlp_params(key, n_embd):
    """Deterministic init mimicking nn.Linear: U(-1/sqrt(fan_in), 1/sqrt(fan_in)).

    Weights are stored [in, out] (transposed vs PyTorch) for row-major matmul."""
    h = 4 * n_embd
    k1, k2, k3, k4 = jax.random.split(key, 4)
    bound_fc = 1.0 / math.sqrt(n_embd)
    bound_proj = 1.0 / math.sqrt(h)
    w_fc = jax.random.uniform(k1, (n_embd, h), jnp.float32, -bound_fc, bound_fc)
    b_fc = jax.random.uniform(k2, (h,), jnp.float32, -bound_fc, bound_fc)
    w_proj = jax.random.uniform(k3, (h, n_embd), jnp.float32, -bound_proj, bound_proj)
    b_proj = jax.random.uniform(k4, (n_embd,), jnp.float32, -bound_proj, bound_proj)
    return w_fc, b_fc, w_proj, b_proj


def mlp_reference_f32(x, w_fc, b_fc, w_proj, b_proj):
    h = jnp.dot(x, w_fc) + b_fc
    h = _gelu_tanh(h)
    return jnp.dot(h, w_proj) + b_proj


def mlp_reference_bf16(x, w_fc, b_fc, w_proj, b_proj):
    # Same numerics as the kernel: bf16 matmul inputs, f32 accumulation.
    h = jnp.dot(x.astype(jnp.bfloat16), w_fc.astype(jnp.bfloat16),
                preferred_element_type=jnp.float32) + b_fc
    h = _gelu_tanh(h)
    return jnp.dot(h.astype(jnp.bfloat16), w_proj.astype(jnp.bfloat16),
                   preferred_element_type=jnp.float32) + b_proj


if __name__ == "__main__":
    key = jax.random.PRNGKey(0)
    k_x, k_p = jax.random.split(key)

    B, T, C = 2, 8, 32  # batch=2, seq=8, n_embd=32 (hidden = 4*C = 128)
    x = jax.random.normal(k_x, (B, T, C), jnp.float32)
    w_fc, b_fc, w_proj, b_proj = init_mlp_params(k_p, C)

    out = mlp_forward(x, w_fc, b_fc, w_proj, b_proj)
    out = jax.block_until_ready(out)
    assert out.shape == (B, T, C)

    # Tight check vs a reference with matching bf16 matmul numerics.
    ref_bf16 = mlp_reference_bf16(x, w_fc, b_fc, w_proj, b_proj)
    assert jnp.allclose(out, ref_bf16, atol=1e-3, rtol=1e-3), "mismatch vs bf16 reference"

    # Loose check vs the full-f32 PyTorch-equivalent reference (bf16 MXU inputs
    # introduce ~1e-2-level relative error, which is expected).
    ref_f32 = mlp_reference_f32(x, w_fc, b_fc, w_proj, b_proj)
    assert jnp.allclose(out, ref_f32, atol=2e-2, rtol=2e-2), "mismatch vs f32 reference"

    print("KERNEL_OK")
</pallas_src>

<mosaic_0001>
module attributes {stable_mosaic.version = 11 : i64} {
  func.func @mlp_kernel(%arg0: i32, %arg1: i32, %arg2: memref<16x32xbf16, #tpu.memory_space<vmem>>, %arg3: memref<32x128xbf16, #tpu.memory_space<vmem>>, %arg4: memref<1x128xf32, #tpu.memory_space<vmem>>, %arg5: memref<128x32xbf16, #tpu.memory_space<vmem>>, %arg6: memref<1x32xf32, #tpu.memory_space<vmem>>, %arg7: memref<16x32xf32, #tpu.memory_space<vmem>>, %arg8: memref<16x32xf32, #tpu.memory_space<vmem>>) attributes {dimension_semantics = [#tpu.dimension_semantics<parallel>, #tpu.dimension_semantics<arbitrary>], iteration_bounds = array<i64: 1, 1>, scalar_prefetch = 0 : i64, scratch_operands = 1 : i64, tpu.core_type = #tpu.core_type<tc>, window_params = [{transform_indices = @transform_0, window_bounds = array<i64: 16, 32>}, {transform_indices = @transform_1, window_bounds = array<i64: 32, 128>}, {transform_indices = @transform_2, window_bounds = array<i64: 1, 128>}, {transform_indices = @transform_3, window_bounds = array<i64: 128, 32>}, {pipeline_mode = #tpu.pipeline_mode<synchronous>, transform_indices = @transform_4, window_bounds = array<i64: 1, 32>}, {transform_indices = @transform_5, window_bounds = array<i64: 16, 32>}]} {
    %c0_i32 = arith.constant 0 : i32
    %0 = arith.cmpi eq, %arg1, %c0_i32 : i32
    %1 = arith.extui %0 : i1 to i32
    %c0_i32_0 = arith.constant 0 : i32
    %2 = arith.cmpi ne, %1, %c0_i32_0 : i32
    scf.if %2 {
      %cst_19 = arith.constant 0.000000e+00 : f32
      %31 = vector.broadcast %cst_19 : f32 to vector<16x32xf32>
      %c0_20 = arith.constant 0 : index
      %c0_21 = arith.constant 0 : index
      %32 = vector.load %arg8[%c0_20, %c0_21] : memref<16x32xf32, #tpu.memory_space<vmem>>, vector<16x32xf32>
      tpu.vector_store %arg8[%c0_20, %c0_21], %31 {strides = array<i32>} : memref<16x32xf32, #tpu.memory_space<vmem>>, vector<16x32xf32>,
    } else {
    }
    %c0 = arith.constant 0 : index
    %c0_1 = arith.constant 0 : index
    %3 = vector.load %arg2[%c0, %c0_1] : memref<16x32xbf16, #tpu.memory_space<vmem>>, vector<16x32xbf16>
    %c0_2 = arith.constant 0 : index
    %c0_3 = arith.constant 0 : index
    %4 = vector.load %arg3[%c0_2, %c0_3] : memref<32x128xbf16, #tpu.memory_space<vmem>>, vector<32x128xbf16>
    %cst = arith.constant dense<0.000000e+00> : vector<16x128xf32>
    %5 = tpu.matmul %3, %4, %cst {dimension_numbers = #tpu.dot_dimension_numbers<[1], [0], [0], [1], [0, 0, 1, 1], [], []>} : vector<16x32xbf16>, vector<32x128xbf16>, vector<16x128xf32> -> vector<16x128xf32>
    %c0_4 = arith.constant 0 : index
    %c0_5 = arith.constant 0 : index
    %6 = vector.load %arg4[%c0_4, %c0_5] : memref<1x128xf32, #tpu.memory_space<vmem>>, vector<1x128xf32>
    %7 = vector.broadcast %6 : vector<1x128xf32> to vector<16x128xf32>
    %8 = arith.addf %5, %7 : vector<16x128xf32>
    %cst_6 = arith.constant 5.000000e-01 : f32
    %9 = vector.broadcast %cst_6 : f32 to vector<16x128xf32>
    %10 = arith.mulf %9, %8 : vector<16x128xf32>
    %cst_7 = arith.constant 4.471500e-02 : f32
    %11 = vector.broadcast %cst_7 : f32 to vector<16x128xf32>
    %12 = arith.mulf %11, %8 : vector<16x128xf32>
    %13 = arith.mulf %12, %8 : vector<16x128xf32>
    %14 = arith.mulf %13, %8 : vector<16x128xf32>
    %15 = arith.addf %8, %14 : vector<16x128xf32>
    %cst_8 = arith.constant 0.797884583 : f32
    %16 = vector.broadcast %cst_8 : f32 to vector<16x128xf32>
    %17 = arith.mulf %16, %15 : vector<16x128xf32>
    %18 = math.tanh %17 : vector<16x128xf32>
    %cst_9 = arith.constant 1.000000e+00 : f32
    %19 = vector.broadcast %cst_9 : f32 to vector<16x128xf32>
    %20 = arith.addf %19, %18 : vector<16x128xf32>
    %21 = arith.mulf %10, %20 : vector<16x128xf32>
    %c0_10 = arith.constant 0 : index
    %c0_11 = arith.constant 0 : index
    %22 = vector.load %arg8[%c0_10, %c0_11] : memref<16x32xf32, #tpu.memory_space<vmem>>, vector<16x32xf32>
    %23 = arith.truncf %21 : vector<16x128xf32> to vector<16x128xbf16>
    %c0_12 = arith.constant 0 : index
    %c0_13 = arith.constant 0 : index
    %24 = vector.load %arg5[%c0_12, %c0_13] : memref<128x32xbf16, #tpu.memory_space<vmem>>, vector<128x32xbf16>
    %cst_14 = arith.constant dense<0.000000e+00> : vector<16x32xf32>
    %25 = tpu.matmul %23, %24, %cst_14 {dimension_numbers = #tpu.dot_dimension_numbers<[1], [0], [0], [1], [0, 0, 1, 1], [], []>} : vector<16x128xbf16>, vector<128x32xbf16>, vector<16x32xf32> -> vector<16x32xf32>
    %26 = arith.addf %22, %25 : vector<16x32xf32>
    %c0_15 = arith.constant 0 : index
    %c0_16 = arith.constant 0 : index
    %27 = vector.load %arg8[%c0_15, %c0_16] : memref<16x32xf32, #tpu.memory_space<vmem>>, vector<16x32xf32>
    tpu.vector_store %arg8[%c0_15, %c0_16], %26 {strides = array<i32>} : memref<16x32xf32, #tpu.memory_space<vmem>>, vector<16x32xf32>,
    %c0_i32_17 = arith.constant 0 : i32
    %28 = arith.cmpi eq, %arg1, %c0_i32_17 : i32
    %29 = arith.extui %28 : i1 to i32
    %c0_i32_18 = arith.constant 0 : i32
    %30 = arith.cmpi ne, %29, %c0_i32_18 : i32
    scf.if %30 {
      %c0_19 = arith.constant 0 : index
      %c0_20 = arith.constant 0 : index
      %31 = vector.load %arg8[%c0_19, %c0_20] : memref<16x32xf32, #tpu.memory_space<vmem>>, vector<16x32xf32>
      %c0_21 = arith.constant 0 : index
      %c0_22 = arith.constant 0 : index
      %32 = vector.load %arg6[%c0_21, %c0_22] : memref<1x32xf32, #tpu.memory_space<vmem>>, vector<1x32xf32>
      %33 = vector.broadcast %32 : vector<1x32xf32> to vector<16x32xf32>
      %34 = arith.addf %31, %33 : vector<16x32xf32>
      %c0_23 = arith.constant 0 : index
      %c0_24 = arith.constant 0 : index
      %35 = vector.load %arg7[%c0_23, %c0_24] : memref<16x32xf32, #tpu.memory_space<vmem>>, vector<16x32xf32>
      tpu.vector_store %arg7[%c0_23, %c0_24], %34 {strides = array<i32>} : memref<16x32xf32, #tpu.memory_space<vmem>>, vector<16x32xf32>,
    } else {
    }
    return
  }
  func.func @transform_0(%arg0: i32, %arg1: i32) -> (i32, i32) {
    %c0_i32 = arith.constant 0 : i32
    %c0_i32_0 = arith.constant 0 : i32
    return %arg0, %c0_i32 : i32, i32
  }
  func.func @transform_1(%arg0: i32, %arg1: i32) -> (i32, i32) {
    %c0_i32 = arith.constant 0 : i32
    %c0_i32_0 = arith.constant 0 : i32
    return %c0_i32, %arg1 : i32, i32
  }
  func.func @transform_2(%arg0: i32, %arg1: i32) -> (i32, i32) {
    %c0_i32 = arith.constant 0 : i32
    %c0_i32_0 = arith.constant 0 : i32
    return %c0_i32, %arg1 : i32, i32
  }
  func.func @transform_3(%arg0: i32, %arg1: i32) -> (i32, i32) {
    %c0_i32 = arith.constant 0 : i32
    %c0_i32_0 = arith.constant 0 : i32
    return %arg1, %c0_i32 : i32, i32
  }
  func.func @transform_4(%arg0: i32, %arg1: i32) -> (i32, i32) {
    %c0_i32 = arith.constant 0 : i32
    %c0_i32_0 = arith.constant 0 : i32
    %c0_i32_1 = arith.constant 0 : i32
    return %c0_i32, %c0_i32_0 : i32, i32
  }
  func.func @transform_5(%arg0: i32, %arg1: i32) -> (i32, i32) {
    %c0_i32 = arith.constant 0 : i32
    %c0_i32_0 = arith.constant 0 : i32
    return %arg0, %c0_i32 : i32, i32
  }
}

</mosaic_0001>

<bundles_post_ra>
// kernel: tpu_custom_call.1
= control target key start
LH: loop header
LB: loop body
LE: loop exit
PB: predicated region body
PF: predicated region fallthrough
CT: control target
= control target key end

     0   :  { %v364_v1 = vmov 0.0   ;;  %vm365_vm0 = vmmov 0   ;;  %vm26_vm1 = vcmask 261120   ;;  %s457_s0 = inlined_call_operand.vmem [shape: bf16[16,32], index: 0, kind: input, shape index: {}]   ;;  %s458_s1 = inlined_call_operand.vmem [shape: bf16[32,128], index: 1, kind: input, shape index: {}]   ;;  %s459_s2 = inlined_call_operand.vmem [shape: f32[1,128], index: 2, kind: input, shape index: {}]   ;;  %s460_s3 = inlined_call_operand.vmem [shape: bf16[128,32], index: 3, kind: input, shape index: {}]   ;;  %s461_s4 = inlined_call_operand.vmem [shape: f32[1,32], index: 4, kind: input, shape index: {}]   ;;  %s462_s5 = inlined_call_operand.hbm [shape: f32[16,32], index: 5, kind: output, shape index: {}]  }
   0x1   :  { %v325_v0 = vld [vmem:[%s458_s1] sm:$0xff]   ;;  %292 = vmatprep.subr.bf16.mxu0 %v364_v1  ;;  %300 = vmatprep.subr.bf16.mxu1 %v364_v1  ;;  %v326_v2 = vld [vmem:[%s458_s1 + $0x8] sm:$0xff]   ;;  %27 = vst.msk [vmem:[#allocation2] sm:$0xff] %vm26_vm1, %v364_v1  ;;  %28 = vst.msk [vmem:[#allocation2 + $0x8] sm:$0xff] %vm26_vm1, %v364_v1 }
   0x2   :  { %293 = vmatpush3.bf16.msra.mxu0 %v325_v0  ;;  %296 = vmatprep.mubr.msk.bf16.mxu0 %vm365_vm0, %v364_v1  ;;  %v327_v3 = vld [vmem:[%s457_s0] sm:$0xff]  }
   0x3   :  { %294 = vmatprep.subr.bf16.mxu0 %v364_v1  ;;  %316 = vmatprep.mubr.msk.bf16.mxu1 %vm365_vm0, %v364_v1 }
   0x6   :  { %295 = vmatpush3.bf16.msra.mxu0 %v326_v2 }
   0x7   :  { %10 = vsyncpa [#allocation4], 0  ;;  %v328_v4 = vld [vmem:[%s460_s3] sm:$0xff]   ;;  %v329_v5 = vld [vmem:[%s460_s3 + $0x8] sm:$0xff]   ;;  %s366_s15 = smov [#allocation3]  }
   0x8   :  { %301 = vmatpush3.bf16.msra.mxu1 %v328_v4  ;;  %v330_v6 = vld [vmem:[%s460_s3 + $0x10] sm:$0xff]   ;;  %v331_v7 = vld [vmem:[%s460_s3 + $0x18] sm:$0xff]   ;;  %v332_v8 = vld [vmem:[%s460_s3 + $0x20] sm:$0xff]   ;;  %s255_s16 = sshll.u32 %s366_s15, 4  ;;  %s256_s16 = int_to_ptr.vmem [resolvable:$true] %s255_s16 }
   0x9   :  { %297 = vmatmul.mubr.msk.bf16.vlgmr.msra.gmra.mrb[0].mxu0 %vm26_vm1, %v327_v3  ;;  %302 = vmatprep.subr.bf16.mxu1 %v364_v1  ;;  %v333_v9 = vld [vmem:[%s460_s3 + $0x28] sm:$0xff]   ;;  %v334_v10 = vld [vmem:[%s460_s3 + $0x30] sm:$0xff]   ;;  %v335_v11 = vld [vmem:[%s460_s3 + $0x38] sm:$0xff]   ;;  %s340_s17 = scalar_lea.vmem %s256_s16, 256  ;;  %p345_p1 = scmp.lt.s32.totalorder %s256_s16, %s256_s16 }
   0xa   :  { %v266_v12 = vld [vmem:[%s459_s2] ss:$0 sm:$0xff]  ;;  %v123_v40 = vld [vmem:[#allocation2 + $0x8] sm:$0xff]  ;;  %p341_p0 = scmp.ne.s32.totalorder %s256_s16, %s340_s17  ;;  %p346_p2 = scmp.lt.s32.totalorder %s340_s17, %s340_s17 }
   0xb   :  { %v122_v38 = vld [vmem:[#allocation2] sm:$0xff] }
   0xc   :  { %303 = vmatpush3.bf16.msra.mxu1 %v329_v5  ;;  %v279_v46 = vld [vmem:[%s461_s4] ss:$0 sm:$0xff]  ;;  %p347_p3 = por %p346_p2, %p345_p1 }
   0xd   :  { %304 = vmatprep.subr.bf16.mxu1 %v364_v1 }
   0xe   :  { %p348_p4 = pnand %p347_p3, %p341_p0 }
  0x10   :  { %305 = vmatpush3.bf16.msra.mxu1 %v330_v6 }
  0x11   :  { %306 = vmatprep.subr.bf16.mxu1 %v364_v1 }
  0x14   :  { %307 = vmatpush3.bf16.msra.mxu1 %v331_v7 }
  0x15   :  { %308 = vmatprep.subr.bf16.mxu1 %v364_v1 }
  0x18   :  { %309 = vmatpush3.bf16.msra.mxu1 %v332_v8 }
  0x19   :  { %310 = vmatprep.subr.bf16.mxu1 %v364_v1 }
  0x1c   :  { %311 = vmatpush3.bf16.msra.mxu1 %v333_v9 }
  0x1d   :  { %312 = vmatprep.subr.bf16.mxu1 %v364_v1 }
  0x20   :  { %313 = vmatpush3.bf16.msra.mxu1 %v334_v10 }
  0x21   :  { %314 = vmatprep.subr.bf16.mxu1 %v364_v1 }
  0x24   :  { %315 = vmatpush3.bf16.msra.mxu1 %v335_v11 }
  0xdc   :  { %v97_v13 = vpop.f32.mrb[0].mxu0 }
  0xdd   :  { %v98_v14 = vadd.f32 %v266_v12, %v97_v13  ;;  %v298_v15 = vpop.f32.mrb[1].mxu0 }
  0xde   :  { %v100_v16 = vpop.f32.mrb[2].mxu0 }
  0xdf   :  { %v106_v17 = vmul.f32 0.044715, %v98_v14  ;;  %v101_v18 = vadd.f32 %v266_v12, %v100_v16  ;;  %v299_v19 = vpop.f32.mrb[3].mxu0  ;;  %v104_v32 = vmul.f32 0.5, %v98_v14 }
  0xe1   :  { %v108_v20 = vmul.f32 %v106_v17, %v98_v14  ;;  %v107_v21 = vmul.f32 0.044715, %v101_v18  ;;  %v105_v33 = vmul.f32 0.5, %v101_v18 }
  0xe3   :  { %v110_v22 = vmul.f32 %v108_v20, %v98_v14  ;;  %v109_v23 = vmul.f32 %v107_v21, %v101_v18 }
  0xe5   :  { %v111_v24 = vmul.f32 %v109_v23, %v101_v18  ;;  %v112_v25 = vadd.f32 %v110_v22, %v98_v14 }
  0xe7   :  { %v113_v26 = vadd.f32 %v111_v24, %v101_v18  ;;  %v114_v27 = vmul.f32 0.7978846, %v112_v25 }
  0xe9   :  { %v115_v28 = vmul.f32 0.7978846, %v113_v26  ;;  %336 = vtanh.f32 %v114_v27 }
  0xeb   :  { %338 = vtanh.f32 %v115_v28 }
  0xf3   :  { %v337_v29 = vpop.eup %336 }
  0xf4   :  { %v118_v30 = vadd.f32 1.0, %v337_v29 }
  0xf5   :  { %v339_v31 = vpop.eup %338 }
  0xf6   :  { %v119_v34 = vadd.f32 1.0, %v339_v31  ;;  %v120_v35 = vmul.f32 %v118_v30, %v104_v32 }
  0xf8   :  { %v121_v36 = vmul.f32 %v119_v34, %v105_v33 }
  0xfa   :  { %v124_v37 = vpack.c.bf16 %v121_v36, %v120_v35 }
  0xfc   :  { %317 = vmatmul.mubr.bf16.vlgmr.msra.gmra.mrb[0].mxu1 %v124_v37 }
 0x1cf   :  { %v223_v39 = vpop.f32.mrb[0].mxu1 }
 0x1d0   :  { %v230_v41 = vadd.f32 %v223_v39, %v122_v38  ;;  %v318_v42 = vpop.f32.mrb[1].mxu1 }
 0x1d1   :  { %v226_v43 = vpop.f32.mrb[2].mxu1 }
 0x1d2   :  { %232 = vst.msk [vmem:[#allocation2] sm:$0xff] %vm26_vm1, %v230_v41  ;;  %v231_v44 = vadd.f32 %v226_v43, %v123_v40  ;;  %v319_v45 = vpop.f32.mrb[3].mxu1 }
 0x1d4   :  { %233 = vst.msk [vmem:[#allocation2 + $0x8] sm:$0xff] %vm26_vm1, %v231_v44 }
 0x1d9   :  { %v237_v47 = vld [vmem:[#allocation2] sm:$0xff] }
 0x1da   :  { %v246_v48 = vadd.f32 %v279_v46, %v237_v47 }
 0x1db   :  { %v238_v49 = vld [vmem:[#allocation2 + $0x8] sm:$0xff] }
 0x1dc   :  { %v247_v50 = vadd.f32 %v279_v46, %v238_v49  ;;  %248 = vst.msk [vmem:[#allocation3] sm:$0xff] %vm26_vm1, %v246_v48 }
 0x1de   :  { %249 = vst.msk [vmem:[#allocation3 + $0x8] sm:$0xff] %vm26_vm1, %v247_v50 }
 0x1df   :  { %351 = shalt.err (!%p348_p4)
}
 0x1e0   :  { %s352_s19 = scalar_lea.hbm %s462_s5, 256 }
 0x1e1   :  { %p353_p5 = scmp.ne.s32.totalorder %s462_s5, %s352_s19  ;;  %p356_p6 = scmp.lt.u32.totalorder %s352_s19, %s462_s5 }
 0x1e3   :  { %p358_p7 = pnand %p356_p6, %p353_p5 }
 0x1e5   :  { %361 = shalt.err (!%p358_p7)
}
 0x1e6   :  { %s367_s24 = smov 128   ;;  %s368_s25 = smov 8  }
 0x1e7   :  { %261 = dma.vmem_to_hbm [thread:$0]  %s256_s16, 256, %s462_s5, [#allocation4], %s367_s24, %s367_s24, %s368_s25  }
 0x1e8   :  { %362 = dma.done.wait [#allocation4], 256  }
 0x1e9   :  { %363 = vsyncadd [#allocation4], 4294967040 }
 0x1ea   :  { %265 = vsyncpa [#allocation4], 1 }

</bundles_post_ra>
